<compile_context>
chip_gen: v7x
topology: tpu7x:2x2x1
jax: 0.10.0
libtpu: 0.0.40
codegen_flags: <defaults>
</compile_context>

<pallas_src>
import math

import jax
import jax.numpy as jnp
from jax import lax
from jax.experimental import pallas as pl
from jax.experimental.pallas import tpu as pltpu


def _conv_ds_kernel(p_ref, w_ref, b_ref, o_ref):
    """One (Co, blk) output tile of the 3x3 / stride-2 conv as a single GEMM.

    p_ref: (1, 9*Cin, blk)  im2col patches; row (kh*3 + kw)*Cin + ci holds
           input pixel (2*ho + kh, 2*u + kw) for flat position m = ho*U + u.
    w_ref: (Co, 9*Cin)      resident weights, same (kh, kw, ci) row order.
    b_ref: (Co, 1)          f32 bias, resident.
    o_ref: (1, Co, blk)     lane-dense output tile (junk cols sliced off later).
    """
    acc = jnp.dot(w_ref[...], p_ref[0], preferred_element_type=jnp.float32)
    o_ref[0, :, :] = (acc + b_ref[...]).astype(o_ref.dtype)


def _cdiv(a, b):
    return -(-a // b)


def _round_up(a, b):
    return _cdiv(a, b) * b


def _vmem_plan():
    """Chip-aware per-step VMEM budget and explicit scoped-VMEM limit."""
    try:
        cap = int(getattr(pltpu.get_tpu_info(), "vmem_capacity_bytes"))
    except Exception:
        cap = 64 << 20                      # conservative fallback (v7x per-core)
    # ~32 MiB working-set budget on v5e/v6e (128 MiB VMEM), ~16 MiB on v7x (64 MiB).
    budget = min(max(cap // 4, 8 << 20), 40 << 20)
    limit = min((cap * 3) // 4, 100 << 20)  # passed as vmem_limit_bytes
    return budget, limit


def _pick_blk(m, cin, cout, n_imgs, in_bytes, out_bytes, budget):
    """Flattened-tile width: a multiple of 128 sized to the VMEM budget."""
    # Per flattened element: im2col tap (9*Cin rows, double-buffered) +
    # output block (double-buffered) + the live f32 accumulator.
    per_elem = 9 * cin * in_bytes * 2 + cout * out_bytes * 2 + cout * 4
    # Resident weights (double-buffered by the pipeline), bias, slack.
    fixed = 2 * (cout * 9 * cin * in_bytes) + 2 * (cout * 4) + (256 << 10)
    avail = max(budget - fixed, 128 * per_elem)
    blk = max(128, (avail // per_elem) // 128 * 128)
    blk = min(blk, _round_up(m, 128))
    n_j = _cdiv(m, blk)
    # v7x has 2 TensorCores per chip: a single-image call should still expose
    # >= 2 parallel grid steps so both cores get work.
    if n_imgs == 1 and n_j == 1 and m > 128:
        blk = _round_up(_cdiv(m, 2), 128)
        n_j = _cdiv(m, blk)
    return blk, n_j, n_j * blk


def downsample_block(x_nchw, weight, bias, *, compute_dtype=jnp.bfloat16):
    """Conv2d(C, C, kernel_size=3, stride=2, padding=0); NCHW in, NCHW out.

    compute_dtype: operand dtype fed to the MXU (accumulation is always f32).
                   bf16 by default for bandwidth; pass jnp.float32 for exact
                   parity with the PyTorch module.
    """
    n, cin, h, w = x_nchw.shape
    cout, cin_w, kh_, kw_ = weight.shape
    assert (kh_, kw_) == (3, 3) and cin_w == cin
    assert h >= 3 and w >= 3

    ho = (h - 3) // 2 + 1
    wo = (w - 3) // 2 + 1
    u = wo + 1                      # columns kept per output row (incl. 1 junk)
    m = ho * u                      # flattened spatial extent per image

    in_bytes = jnp.dtype(compute_dtype).itemsize
    out_bytes = jnp.dtype(x_nchw.dtype).itemsize
    budget, vmem_limit = _vmem_plan()
    blk, n_j, m_pad = _pick_blk(m, cin, cout, n, in_bytes, out_bytes, budget)

    # ---- im2col patches: (N, 9*Cin, M_pad), row (kh*3+kw)*Cin + ci ----------
    x_c = x_nchw.astype(compute_dtype)
    parts = []
    for kh in range(3):
        for kw in range(3):
            u_take = min((w - 1 - kw) // 2 + 1, u)
            a = lax.slice(
                x_c,
                (0, 0, kh, kw),
                (n, cin, kh + 2 * (ho - 1) + 1, kw + 2 * (u_take - 1) + 1),
                (1, 1, 2, 2),
            )                                                   # (N, Cin, Ho, u_take)
            a = jnp.pad(a, ((0, 0), (0, 0), (0, 0), (0, u - u_take)))
            parts.append(a)
    patches = jnp.concatenate(parts, axis=1)                    # (N, 9Cin, Ho, U)
    patches = patches.reshape(n, 9 * cin, m)
    patches = jnp.pad(patches, ((0, 0), (0, 0), (0, m_pad - m)))

    # ---- weights / bias ------------------------------------------------------
    w_r = jnp.transpose(weight, (0, 2, 3, 1)).reshape(cout, 9 * cin)
    w_r = w_r.astype(compute_dtype)                             # (Co, 9Cin) resident
    b_r = bias.reshape(cout, 1).astype(jnp.float32)

    out_flat = pl.pallas_call(
        _conv_ds_kernel,
        out_shape=jax.ShapeDtypeStruct((n, cout, m_pad), x_nchw.dtype),
        grid=(n, n_j),
        in_specs=[
            pl.BlockSpec((1, 9 * cin, blk), lambda i, j: (i, 0, j)),
            pl.BlockSpec((cout, 9 * cin), lambda i, j: (0, 0)),   # resident weights
            pl.BlockSpec((cout, 1), lambda i, j: (0, 0)),         # resident bias
        ],
        out_specs=pl.BlockSpec((1, cout, blk), lambda i, j: (i, 0, j)),
        compiler_params=pltpu.CompilerParams(
            dimension_semantics=("parallel", "parallel"),
            vmem_limit_bytes=int(vmem_limit)),
    )(patches, w_r, b_r)

    # Drop the flat padding and the per-row junk column; result is NCHW.
    out = out_flat[:, :, :m].reshape(n, cout, ho, u)[:, :, :, :wo]
    return out


if __name__ == "__main__":
    key = jax.random.PRNGKey(0)
    k_x, k_w, k_b = jax.random.split(key, 3)

    N, C, H, W = 2, 4, 16, 16
    x = jax.random.normal(k_x, (N, C, H, W), dtype=jnp.float32)

    # Deterministic synthetic parameters (shapes match nn.Conv2d(C, C, 3, stride=2)).
    fan_in = C * 3 * 3
    bound = 1.0 / math.sqrt(fan_in)
    weight = jax.random.uniform(k_w, (C, C, 3, 3), minval=-bound, maxval=bound,
                                dtype=jnp.float32)
    bias = jax.random.uniform(k_b, (C,), minval=-bound, maxval=bound,
                              dtype=jnp.float32)

    # References: XLA conv with the same semantics as torch Conv2d (NCHW/OIHW).
    ref_f32 = lax.conv_general_dilated(
        x, weight, window_strides=(2, 2), padding="VALID",
        dimension_numbers=("NCHW", "OIHW", "NCHW"),
    ) + bias.reshape(1, C, 1, 1)
    ref_bf16 = lax.conv_general_dilated(
        x.astype(jnp.bfloat16), weight.astype(jnp.bfloat16),
        window_strides=(2, 2), padding="VALID",
        dimension_numbers=("NCHW", "OIHW", "NCHW"),
        preferred_element_type=jnp.float32,
    ) + bias.reshape(1, C, 1, 1)

    # Default (bf16 operands, f32 accumulation) path.
    fwd = jax.jit(downsample_block)
    out = jax.block_until_ready(fwd(x, weight, bias))

    # f32-operand path (exact module semantics).
    fwd_f32 = jax.jit(lambda a, b, c: downsample_block(a, b, c,
                                                       compute_dtype=jnp.float32))
    out_f32 = jax.block_until_ready(fwd_f32(x, weight, bias))

    assert out.shape == (N, C, 7, 7), out.shape
    assert out.dtype == x.dtype
    assert jnp.allclose(out_f32, ref_f32, atol=1e-4, rtol=1e-4), \
        float(jnp.max(jnp.abs(out_f32 - ref_f32)))
    assert jnp.allclose(out, ref_bf16, atol=5e-3, rtol=5e-3), \
        float(jnp.max(jnp.abs(out - ref_bf16)))
    assert jnp.allclose(out, ref_f32, atol=5e-2, rtol=5e-2), \
        float(jnp.max(jnp.abs(out - ref_f32)))

    print("KERNEL_OK")
</pallas_src>

<mosaic_0001>
module attributes {stable_mosaic.version = 11 : i64} {
  func.func @_conv_ds_kernel(%arg0: i32, %arg1: i32, %arg2: memref<1x36x128xbf16, #tpu.memory_space<vmem>>, %arg3: memref<4x36xbf16, #tpu.memory_space<vmem>>, %arg4: memref<4x1xf32, #tpu.memory_space<vmem>>, %arg5: memref<1x4x128xf32, #tpu.memory_space<vmem>>) attributes {dimension_semantics = [#tpu.dimension_semantics<parallel>, #tpu.dimension_semantics<parallel>], iteration_bounds = array<i64: 2, 1>, scalar_prefetch = 0 : i64, scratch_operands = 0 : i64, tpu.core_type = #tpu.core_type<tc>, window_params = [{transform_indices = @transform_0, window_bounds = array<i64: 1, 36, 128>}, {pipeline_mode = #tpu.pipeline_mode<synchronous>, transform_indices = @transform_1, window_bounds = array<i64: 4, 36>}, {pipeline_mode = #tpu.pipeline_mode<synchronous>, transform_indices = @transform_2, window_bounds = array<i64: 4, 1>}, {transform_indices = @transform_3, window_bounds = array<i64: 1, 4, 128>}]} {
    %c0 = arith.constant 0 : index
    %c0_0 = arith.constant 0 : index
    %0 = vector.load %arg3[%c0, %c0_0] : memref<4x36xbf16, #tpu.memory_space<vmem>>, vector<4x36xbf16>
    %c0_1 = arith.constant 0 : index
    %c0_2 = arith.constant 0 : index
    %c0_3 = arith.constant 0 : index
    %1 = vector.load %arg2[%c0_1, %c0_2, %c0_3] : memref<1x36x128xbf16, #tpu.memory_space<vmem>>, vector<1x36x128xbf16>
    %2 = vector.shape_cast %1 : vector<1x36x128xbf16> to vector<36x128xbf16>
    %cst = arith.constant dense<0.000000e+00> : vector<4x128xf32>
    %3 = tpu.matmul %0, %2, %cst {dimension_numbers = #tpu.dot_dimension_numbers<[1], [0], [0], [1], [0, 0, 1, 1], [], []>} : vector<4x36xbf16>, vector<36x128xbf16>, vector<4x128xf32> -> vector<4x128xf32>
    %c0_4 = arith.constant 0 : index
    %c0_5 = arith.constant 0 : index
    %4 = vector.load %arg4[%c0_4, %c0_5] : memref<4x1xf32, #tpu.memory_space<vmem>>, vector<4x1xf32>
    %5 = vector.broadcast %4 : vector<4x1xf32> to vector<4x128xf32>
    %6 = arith.addf %3, %5 : vector<4x128xf32>
    %c0_6 = arith.constant 0 : index
    %c0_7 = arith.constant 0 : index
    %c0_8 = arith.constant 0 : index
    %7 = vector.load %arg5[%c0_6, %c0_7, %c0_8] : memref<1x4x128xf32, #tpu.memory_space<vmem>>, vector<1x4x128xf32>
    %8 = vector.shape_cast %7 : vector<1x4x128xf32> to vector<4x128xf32>
    %9 = vector.shape_cast %6 : vector<4x128xf32> to vector<1x4x128xf32>
    tpu.vector_store %arg5[%c0_6, %c0_7, %c0_8], %9 {strides = array<i32>} : memref<1x4x128xf32, #tpu.memory_space<vmem>>, vector<1x4x128xf32>,
    return
  }
  func.func @transform_0(%arg0: i32, %arg1: i32) -> (i32, i32, i32) {
    %c0_i32 = arith.constant 0 : i32
    %c0_i32_0 = arith.constant 0 : i32
    return %arg0, %c0_i32, %arg1 : i32, i32, i32
  }
  func.func @transform_1(%arg0: i32, %arg1: i32) -> (i32, i32) {
    %c0_i32 = arith.constant 0 : i32
    %c0_i32_0 = arith.constant 0 : i32
    %c0_i32_1 = arith.constant 0 : i32
    return %c0_i32, %c0_i32_0 : i32, i32
  }
  func.func @transform_2(%arg0: i32, %arg1: i32) -> (i32, i32) {
    %c0_i32 = arith.constant 0 : i32
    %c0_i32_0 = arith.constant 0 : i32
    %c0_i32_1 = arith.constant 0 : i32
    return %c0_i32, %c0_i32_0 : i32, i32
  }
  func.func @transform_3(%arg0: i32, %arg1: i32) -> (i32, i32, i32) {
    %c0_i32 = arith.constant 0 : i32
    %c0_i32_0 = arith.constant 0 : i32
    return %arg0, %c0_i32, %arg1 : i32, i32, i32
  }
}

</mosaic_0001>

<bundles_post_ra>
// kernel: downsample_block.1
= control target key start
LH: loop header
LB: loop body
LE: loop exit
PB: predicated region body
PF: predicated region fallthrough
CT: control target
= control target key end

     0   :  { %s460_s12 = smov 0   ;;  %s462_s13 = smov 0   ;;  %s499_s0 = inlined_call_operand.vmem [shape: bf16[2,36,128], index: 0, kind: input, shape index: {}]   ;;  %s500_s1 = inlined_call_operand.vmem [shape: bf16[4,36], index: 1, kind: input, shape index: {}]   ;;  %s501_s2 = inlined_call_operand.vmem [shape: f32[4,1], index: 2, kind: input, shape index: {}]   ;;  %s502_s3 = inlined_call_operand.vmem [shape: f32[2,4,128], index: 3, kind: output, shape index: {}]  }
   0x1   :  { %s464_s14 = smov 0  }
   0x2 LB: > { %s25_s15 = sadd.s32 1, %s431_s13  ;;  %p358_p0 = scmp.ge.s32.totalorder %s435_s14, 1  ;;  %s435_s14 = sphi %s464_s14, %s13_s14   ;;  %s431_s13 = sphi %s462_s13, %s504_s13   ;;  %s427_s12 = sphi %s460_s12, %s503_s12  }
   0x3   : > { %p27_p1 = scmp.ge.s32.totalorder %s25_s15, 2  ;;  %p156_p2 = scmp.lt.s32.totalorder %s435_s14, 3 }
   0x5   : > { %s506_s15 = smov (%p27_p1, %s25_s15), 0  ;;  %p157_p3 = pnand %p358_p0, %p156_p2 }
   0x6   : > { %p185_p4 = scmp.lt.s32.totalorder (!%p157_p3), %s427_s12, 1  ;;  %v437_v0 = vmov (!%p157_p3), 0.0   ;;  %vm438_vm0 = vmmov (!%p157_p3), 0   ;;  %v207_v1 = vld [vmem:[%s501_s2] sm:$0xf] (!%p157_p3)  ;;  %v439_v2 = vmov (!%p157_p3), 0  }
   0x7   : > { %160 = sbr.rel (%p157_p3) target bundleno = 245 (0xf5), region = 32  ;;  %371 = vmatprep.subr.bf16.mxu0 (!%p157_p3), %v437_v0  ;;  %377 = vmatprep.mubr.msk.bf16.mxu0 (!%p157_p3), %vm438_vm0, %v437_v0  ;;  %vm232_vm1 = vcmask (!%p157_p3), 1041408   ;;  %v201_v7 = vld [vmem:[%s500_s1] sm:$0x3] (!%p157_p3)  ;;  %vm228_vm2 = vcmask (!%p157_p3), 293888  }
   0x8   : > { %409 = vset.pattern.permute.xlu0 (!%p157_p3), %v439_v2 }
   0x9   : > { %210 = vperm.xlu0 (!%p157_p3), %409, %v207_v1  }
   0xe   : > { %s508_s12 = smov (!%p185_p4, %s427_s12), 1 }
   0xf   : > { %s381_s18 = smul.u32 20, %s508_s12  ;;  %s360_s24 = sshll.u32 %s508_s12, 2 }
  0x10   : > { %s199_s27 = scalar_lea.vmem %s502_s3, %s360_s24 }
  0x11   : > { %s192_s21 = scalar_lea.vmem %s499_s0, %s381_s18 }
  0x12   : > { %v410_v3 = vld [vmem:[%s192_s21] sm:$0xff]   ;;  %v411_v4 = vld [vmem:[%s192_s21 + $0x8] sm:$0xff]   ;;  %v412_v5 = vld [vmem:[%s192_s21 + $0x10] ss:$0 sps:$4 sm:$0x33]  }
  0x13   : > { %372 = vmatpush3.bf16.msra.mxu0 %v410_v3  ;;  %v234_v6 = vsel %vm232_vm1, %v412_v5, 0 }
  0x14   : > { %373 = vmatprep.subr.bf16.mxu0 %v437_v0 }
  0x17   : > { %374 = vmatpush3.bf16.msra.mxu0 %v411_v4 }
  0x18   : > { %375 = vmatprep.subr.bf16.mxu0 %v437_v0 }
  0x1b   : > { %376 = vmatpush3.bf16.msra.mxu0 %v234_v6 }
  0x1e   : > { %378 = vmatmul.mubr.msk.bf16.vlgmr.msra.gmra.mrb[0].mxu0 %vm228_vm2, %v201_v7 }
  0x88   : > { %v211_v8 = vpop.permute.xlu0 %210 }
  0xf1   : > { %v270_v9 = vpop.f32.mrb[0].mxu0 }
  0xf2   : > { %v271_v10 = vadd.f32 %v270_v9, %v211_v8  ;;  %v379_v11 = vpop.f32.mrb[1].mxu0 }
  0xf3   : > { %v273_v12 = vpop.f32.mrb[2].mxu0 }
  0xf4   : > { %276 = vst [vmem:[%s199_s27] sm:$0xf] %v271_v10  ;;  %v380_v13 = vpop.f32.mrb[3].mxu0 }
  0xf5 PF: > { %s13_s14 = sadd.s32 1, %s435_s14   ;;  %s503_s12 = smov %s431_s13 }
  0xf6   : > { %p10_p5 = scmp.ge.s32.totalorder %s13_s14, 4   ;;  %s504_s13 = smov %s506_s15 }
  0xf8   :  { %12 = sbr.rel (!%p10_p5) target bundleno = 2 (0x2), region = 62 }

</bundles_post_ra>
